<compile_context>
chip_gen: v7x
topology: tpu7x:2x2x1
jax: 0.10.0
libtpu: 0.0.40
codegen_flags: <defaults>
</compile_context>

<pallas_src>
import functools

import jax
import jax.numpy as jnp
from jax import lax
from jax.experimental import pallas as pl
from jax.experimental.pallas import tpu as pltpu


def _round_up(x: int, m: int) -> int:
    return (x + m - 1) // m * m


def _pad_lanes(d: int) -> int:
    # <=128 -> 128 (saturates v5e's 128-wide MXU); >128 -> multiple of 256
    # (v6e/v7x MXUs are 256x256; 128-wide tiles half-fill them).
    return _round_up(d, 128) if d <= 128 else _round_up(d, 256)


def _mlp_kernel(x_ref, w1_ref, b1_ref, w2_ref, b2_ref, hid_ref, out_ref,
                *, n_out, out_p):
    """One batch tile: hidden = relu(x@W1+b1); probs = softmax(hidden@W2+b2)."""
    # x arrives f32; bf16 cast rides a free VPU slot under the MXU / DMA.
    x = x_ref[...].astype(jnp.bfloat16)                             # (TB, IN_P)

    # Hidden layer: bf16 MXU matmul, f32 accumulate; bias + ReLU in f32 (VPU).
    h = jnp.dot(x, w1_ref[...], preferred_element_type=jnp.float32)
    h = jnp.maximum(h + b1_ref[...], 0.0)                           # (TB, HID_P) f32
    hid_ref[...] = h.astype(hid_ref.dtype)                          # bf16 store

    # Output layer: bf16 MXU matmul, f32 accumulate + bias.
    logits = jnp.dot(h.astype(w2_ref.dtype), w2_ref[...],
                     preferred_element_type=jnp.float32) + b2_ref[...]

    # Only mask padded output lanes when padding actually exists (trace-time).
    if n_out < out_p:
        lane = lax.broadcasted_iota(jnp.int32, logits.shape, 1)
        logits = jnp.where(lane < n_out, logits, jnp.float32(-1e30))

    # Numerically-stable softmax; exact divide so rows sum to 1 for sampling.
    m = jnp.max(logits, axis=-1, keepdims=True)
    e = jnp.exp(logits - m)
    out_ref[...] = (e / jnp.sum(e, axis=-1, keepdims=True)).astype(out_ref.dtype)


def prepare_params(w1, b1, w2, b2):
    """One-time padding / bf16 cast of the parameters (amortized across calls).
    w1: (n_in, n_hid); b1: (1, n_hid); w2: (n_hid, n_out); b2: (1, n_out)."""
    n_in, n_hid = w1.shape
    n_out = w2.shape[1]
    IN_P, HID_P, OUT_P = _pad_lanes(n_in), _pad_lanes(n_hid), _pad_lanes(n_out)
    w1p = jnp.zeros((IN_P, HID_P), jnp.bfloat16).at[:n_in, :n_hid].set(w1.astype(jnp.bfloat16))
    b1p = jnp.zeros((1, HID_P), jnp.float32).at[:, :n_hid].set(b1.astype(jnp.float32))
    w2p = jnp.zeros((HID_P, OUT_P), jnp.bfloat16).at[:n_hid, :n_out].set(w2.astype(jnp.bfloat16))
    b2p = jnp.zeros((1, OUT_P), jnp.float32).at[:, :n_out].set(b2.astype(jnp.float32))
    return w1p, b1p, w2p, b2p


def network_forward(x, w1p, b1p, w2p, b2p, *, n_hidden, n_outputs):
    """x: (B, n_in) f32; padded params from prepare_params().
    Returns (hidden (B, n_hidden) bf16, probs (B, n_outputs) f32)."""
    B, n_in = x.shape
    IN_P, HID_P = w1p.shape
    OUT_P = w2p.shape[1]

    # Batch tile: bf16 hidden packs 16 sublanes/vreg -> round to 16; big tiles
    # amortize the ~0.35 us/step overhead; split so the grid has >= 2 steps
    # when the batch allows it (v7x: 2 TensorCores share the parallel axis).
    TILE_B = min(512, _round_up(B, 16))
    if B > 16 and _round_up(B, TILE_B) == TILE_B:
        TILE_B = _round_up(pl.cdiv(B, 2), 16)
    B_P = _round_up(B, TILE_B)

    # Pad x (f32) only when the shape is not already tile-aligned.
    x = x.astype(jnp.float32)
    if (B, n_in) != (B_P, IN_P):
        xp = jnp.zeros((B_P, IN_P), jnp.float32).at[:B, :n_in].set(x)
    else:
        xp = x

    grid = (B_P // TILE_B,)
    kernel = functools.partial(_mlp_kernel, n_out=n_outputs, out_p=OUT_P)

    # Working set (double-buffered tiles + resident params) + slack, capped at
    # v7x's 64 MiB per-TC VMEM.
    working_set = 2 * (TILE_B * IN_P * 4      # x tile (f32)
                       + TILE_B * HID_P * 2   # hidden tile (bf16)
                       + TILE_B * OUT_P * 4   # probs tile (f32)
                       + IN_P * HID_P * 2 + HID_P * 4
                       + HID_P * OUT_P * 2 + OUT_P * 4)
    vmem_limit = min(64 * 1024 * 1024,
                     max(4 * 1024 * 1024, working_set + 2 * 1024 * 1024))

    cost = pl.CostEstimate(
        flops=2 * B_P * (IN_P * HID_P + HID_P * OUT_P),
        transcendentals=B_P * OUT_P,
        bytes_accessed=(B_P * IN_P * 4
                        + IN_P * HID_P * 2 + HID_P * 4
                        + HID_P * OUT_P * 2 + OUT_P * 4
                        + B_P * HID_P * 2 + B_P * OUT_P * 4),
    )

    hidden_p, probs_p = pl.pallas_call(
        kernel,
        out_shape=(
            jax.ShapeDtypeStruct((B_P, HID_P), jnp.bfloat16),   # hidden (bf16)
            jax.ShapeDtypeStruct((B_P, OUT_P), jnp.float32),    # softmax probs
        ),
        grid_spec=pltpu.PrefetchScalarGridSpec(
            num_scalar_prefetch=0,
            grid=grid,
            in_specs=[
                pl.BlockSpec((TILE_B, IN_P), lambda i: (i, 0)),   # x: tiled over batch
                pl.BlockSpec((IN_P, HID_P), lambda i: (0, 0)),    # W1: resident
                pl.BlockSpec((1, HID_P), lambda i: (0, 0)),       # b1: resident
                pl.BlockSpec((HID_P, OUT_P), lambda i: (0, 0)),   # W2: resident
                pl.BlockSpec((1, OUT_P), lambda i: (0, 0)),       # b2: resident
            ],
            out_specs=[
                pl.BlockSpec((TILE_B, HID_P), lambda i: (i, 0)),
                pl.BlockSpec((TILE_B, OUT_P), lambda i: (i, 0)),
            ],
        ),
        compiler_params=pltpu.CompilerParams(
            dimension_semantics=("parallel",),
            vmem_limit_bytes=vmem_limit,
        ),
        cost_estimate=cost,
    )(xp, w1p, b1p, w2p, b2p)

    # Slice padding away outside the kernel (keeps in-kernel stores lane-dense).
    # Hidden stays bf16 (callers needing f32 can upcast; probs stay exact f32).
    return hidden_p[:B, :n_hidden], probs_p[:B, :n_outputs]


def init_params(key, n_inputs, n_hidden, n_outputs):
    """Matches nn.Linear's default U(-1/sqrt(fan_in), 1/sqrt(fan_in)) init.
    Weights stored as (in, out) == transpose of PyTorch's (out, in)."""
    k1, k2, k3, k4 = jax.random.split(key, 4)
    bound1 = 1.0 / jnp.sqrt(jnp.float32(n_inputs))
    bound2 = 1.0 / jnp.sqrt(jnp.float32(n_hidden))
    w1 = jax.random.uniform(k1, (n_inputs, n_hidden), jnp.float32, -bound1, bound1)
    b1 = jax.random.uniform(k2, (1, n_hidden), jnp.float32, -bound1, bound1)
    w2 = jax.random.uniform(k3, (n_hidden, n_outputs), jnp.float32, -bound2, bound2)
    b2 = jax.random.uniform(k4, (1, n_outputs), jnp.float32, -bound2, bound2)
    return w1, b1, w2, b2


if __name__ == "__main__":
    # Shapes implied by the module: n_inputs = obs dim, n_hidden, n_outputs = action dim.
    B, n_inputs, n_hidden, n_outputs = 2, 4, 32, 4

    key = jax.random.PRNGKey(0)
    kx, kp = jax.random.split(key)
    x = jax.random.normal(kx, (B, n_inputs), jnp.float32)
    w1, b1, w2, b2 = init_params(kp, n_inputs, n_hidden, n_outputs)

    # One-time parameter packing (padding + bf16 cast), hoisted out of forward.
    packed = prepare_params(w1, b1, w2, b2)
    packed = jax.block_until_ready(packed)

    fwd = jax.jit(functools.partial(network_forward,
                                    n_hidden=n_hidden, n_outputs=n_outputs))
    hidden, probs = fwd(x, *packed)
    jax.block_until_ready((hidden, probs))

    # Sanity check vs. pure-JAX f32 reference (looser tolerance: bf16 MXU path).
    ref_h = jnp.maximum(x @ w1 + b1, 0.0)
    ref_p = jax.nn.softmax(ref_h @ w2 + b2, axis=1)
    assert hidden.shape == (B, n_hidden) and probs.shape == (B, n_outputs)
    assert jnp.allclose(hidden.astype(jnp.float32), ref_h, atol=3e-2, rtol=3e-2), "hidden mismatch"
    assert jnp.allclose(probs, ref_p, atol=3e-2, rtol=3e-2), "probs mismatch"

    # TODO(synk): get_action's host-side numpy rng.choice sampling and the SGD
    # optimizer/autograd are training/host logic with no Pallas equivalent;
    # only forward() is kernelized.
    print("KERNEL_OK")
</pallas_src>

<mosaic_0001>
module attributes {stable_mosaic.version = 11 : i64} {
  func.func @_mlp_kernel(%arg0: i32, %arg1: memref<16x128xf32, #tpu.memory_space<vmem>>, %arg2: memref<128x128xbf16, #tpu.memory_space<vmem>>, %arg3: memref<1x128xf32, #tpu.memory_space<vmem>>, %arg4: memref<128x128xbf16, #tpu.memory_space<vmem>>, %arg5: memref<1x128xf32, #tpu.memory_space<vmem>>, %arg6: memref<16x128xbf16, #tpu.memory_space<vmem>>, %arg7: memref<16x128xf32, #tpu.memory_space<vmem>>) attributes {dimension_semantics = [#tpu.dimension_semantics<parallel>], iteration_bounds = array<i64: 1>, scalar_prefetch = 0 : i64, scratch_operands = 0 : i64, tpu.core_type = #tpu.core_type<tc>, window_params = [{transform_indices = @transform_0, window_bounds = array<i64: 16, 128>}, {pipeline_mode = #tpu.pipeline_mode<synchronous>, transform_indices = @transform_1, window_bounds = array<i64: 128, 128>}, {pipeline_mode = #tpu.pipeline_mode<synchronous>, transform_indices = @transform_2, window_bounds = array<i64: 1, 128>}, {pipeline_mode = #tpu.pipeline_mode<synchronous>, transform_indices = @transform_3, window_bounds = array<i64: 128, 128>}, {pipeline_mode = #tpu.pipeline_mode<synchronous>, transform_indices = @transform_4, window_bounds = array<i64: 1, 128>}, {transform_indices = @transform_5, window_bounds = array<i64: 16, 128>}, {transform_indices = @transform_6, window_bounds = array<i64: 16, 128>}]} {
    %c0 = arith.constant 0 : index
    %c0_0 = arith.constant 0 : index
    %0 = vector.load %arg1[%c0, %c0_0] : memref<16x128xf32, #tpu.memory_space<vmem>>, vector<16x128xf32>
    %1 = arith.truncf %0 : vector<16x128xf32> to vector<16x128xbf16>
    %c0_1 = arith.constant 0 : index
    %c0_2 = arith.constant 0 : index
    %2 = vector.load %arg2[%c0_1, %c0_2] : memref<128x128xbf16, #tpu.memory_space<vmem>>, vector<128x128xbf16>
    %cst = arith.constant dense<0.000000e+00> : vector<16x128xf32>
    %3 = tpu.matmul %1, %2, %cst {dimension_numbers = #tpu.dot_dimension_numbers<[1], [0], [0], [1], [0, 0, 1, 1], [], []>} : vector<16x128xbf16>, vector<128x128xbf16>, vector<16x128xf32> -> vector<16x128xf32>
    %c0_3 = arith.constant 0 : index
    %c0_4 = arith.constant 0 : index
    %4 = vector.load %arg3[%c0_3, %c0_4] : memref<1x128xf32, #tpu.memory_space<vmem>>, vector<1x128xf32>
    %5 = vector.broadcast %4 : vector<1x128xf32> to vector<16x128xf32>
    %6 = arith.addf %3, %5 : vector<16x128xf32>
    %cst_5 = arith.constant 0.000000e+00 : f32
    %7 = vector.broadcast %cst_5 : f32 to vector<16x128xf32>
    %8 = arith.maximumf %6, %7 : vector<16x128xf32>
    %9 = arith.truncf %8 : vector<16x128xf32> to vector<16x128xbf16>
    %c0_6 = arith.constant 0 : index
    %c0_7 = arith.constant 0 : index
    %10 = vector.load %arg6[%c0_6, %c0_7] : memref<16x128xbf16, #tpu.memory_space<vmem>>, vector<16x128xbf16>
    tpu.vector_store %arg6[%c0_6, %c0_7], %9 {strides = array<i32>} : memref<16x128xbf16, #tpu.memory_space<vmem>>, vector<16x128xbf16>,
    %11 = arith.truncf %8 : vector<16x128xf32> to vector<16x128xbf16>
    %c0_8 = arith.constant 0 : index
    %c0_9 = arith.constant 0 : index
    %12 = vector.load %arg4[%c0_8, %c0_9] : memref<128x128xbf16, #tpu.memory_space<vmem>>, vector<128x128xbf16>
    %cst_10 = arith.constant dense<0.000000e+00> : vector<16x128xf32>
    %13 = tpu.matmul %11, %12, %cst_10 {dimension_numbers = #tpu.dot_dimension_numbers<[1], [0], [0], [1], [0, 0, 1, 1], [], []>} : vector<16x128xbf16>, vector<128x128xbf16>, vector<16x128xf32> -> vector<16x128xf32>
    %c0_11 = arith.constant 0 : index
    %c0_12 = arith.constant 0 : index
    %14 = vector.load %arg5[%c0_11, %c0_12] : memref<1x128xf32, #tpu.memory_space<vmem>>, vector<1x128xf32>
    %15 = vector.broadcast %14 : vector<1x128xf32> to vector<16x128xf32>
    %16 = arith.addf %13, %15 : vector<16x128xf32>
    %17 = tpu.iota {dimensions = array<i32: 1>} : vector<16x128xi32>
    %c4_i32 = arith.constant 4 : i32
    %18 = vector.broadcast %c4_i32 : i32 to vector<16x128xi32>
    %19 = arith.cmpi slt, %17, %18 : vector<16x128xi32>
    %cst_13 = arith.constant -1.000000e+30 : f32
    %20 = vector.broadcast %cst_13 : f32 to vector<16x128xf32>
    %21 = arith.select %19, %16, %20 : vector<16x128xi1>, vector<16x128xf32>
    %cst_14 = arith.constant dense<0xFF800000> : vector<16xf32>
    %22 = vector.multi_reduction <maximumf>, %21, %cst_14 [1] : vector<16x128xf32> to vector<16xf32>
    %23 = vector.shape_cast %22 : vector<16xf32> to vector<16x1xf32>
    %24 = vector.broadcast %23 : vector<16x1xf32> to vector<16x128xf32>
    %25 = arith.subf %21, %24 : vector<16x128xf32>
    %26 = math.exp %25 : vector<16x128xf32>
    %cst_15 = arith.constant dense<0.000000e+00> : vector<16xf32>
    %27 = vector.multi_reduction <add>, %26, %cst_15 [1] : vector<16x128xf32> to vector<16xf32>
    %28 = vector.shape_cast %27 : vector<16xf32> to vector<16x1xf32>
    %29 = vector.broadcast %28 : vector<16x1xf32> to vector<16x128xf32>
    %30 = arith.divf %26, %29 : vector<16x128xf32>
    %c0_16 = arith.constant 0 : index
    %c0_17 = arith.constant 0 : index
    %31 = vector.load %arg7[%c0_16, %c0_17] : memref<16x128xf32, #tpu.memory_space<vmem>>, vector<16x128xf32>
    tpu.vector_store %arg7[%c0_16, %c0_17], %30 {strides = array<i32>} : memref<16x128xf32, #tpu.memory_space<vmem>>, vector<16x128xf32>,
    return
  }
  func.func @transform_0(%arg0: i32) -> (i32, i32) {
    %c0_i32 = arith.constant 0 : i32
    %c0_i32_0 = arith.constant 0 : i32
    return %arg0, %c0_i32 : i32, i32
  }
  func.func @transform_1(%arg0: i32) -> (i32, i32) {
    %c0_i32 = arith.constant 0 : i32
    %c0_i32_0 = arith.constant 0 : i32
    %c0_i32_1 = arith.constant 0 : i32
    return %c0_i32, %c0_i32_0 : i32, i32
  }
  func.func @transform_2(%arg0: i32) -> (i32, i32) {
    %c0_i32 = arith.constant 0 : i32
    %c0_i32_0 = arith.constant 0 : i32
    %c0_i32_1 = arith.constant 0 : i32
    return %c0_i32, %c0_i32_0 : i32, i32
  }
  func.func @transform_3(%arg0: i32) -> (i32, i32) {
    %c0_i32 = arith.constant 0 : i32
    %c0_i32_0 = arith.constant 0 : i32
    %c0_i32_1 = arith.constant 0 : i32
    return %c0_i32, %c0_i32_0 : i32, i32
  }
  func.func @transform_4(%arg0: i32) -> (i32, i32) {
    %c0_i32 = arith.constant 0 : i32
    %c0_i32_0 = arith.constant 0 : i32
    %c0_i32_1 = arith.constant 0 : i32
    return %c0_i32, %c0_i32_0 : i32, i32
  }
  func.func @transform_5(%arg0: i32) -> (i32, i32) {
    %c0_i32 = arith.constant 0 : i32
    %c0_i32_0 = arith.constant 0 : i32
    return %arg0, %c0_i32 : i32, i32
  }
  func.func @transform_6(%arg0: i32) -> (i32, i32) {
    %c0_i32 = arith.constant 0 : i32
    %c0_i32_0 = arith.constant 0 : i32
    return %arg0, %c0_i32 : i32, i32
  }
}

</mosaic_0001>

<bundles_post_ra>
// kernel: network_forward.1
= control target key start
LH: loop header
LB: loop body
LE: loop exit
PB: predicated region body
PF: predicated region fallthrough
CT: control target
= control target key end

     0   :  { %12 = vsyncpa [#allocation3], 0  ;;  %s574_s0 = inlined_call_operand.vmem [shape: f32[16,128], index: 0, kind: input, shape index: {}]   ;;  %s575_s1 = inlined_call_operand.hbm [shape: bf16[128,128], index: 1, kind: input, shape index: {}]   ;;  %s576_s2 = inlined_call_operand.vmem [shape: f32[1,128], index: 2, kind: input, shape index: {}]   ;;  %s577_s3 = inlined_call_operand.hbm [shape: bf16[128,128], index: 3, kind: input, shape index: {}]   ;;  %s578_s4 = inlined_call_operand.vmem [shape: f32[1,128], index: 4, kind: input, shape index: {}]   ;;  %s579_s5 = inlined_call_operand.vmem [shape: bf16[16,128], index: 5, kind: output, shape index: {0}]   ;;  %s580_s6 = inlined_call_operand.vmem [shape: f32[16,128], index: 6, kind: output, shape index: {1}]  }
   0x1   :  { %13 = vsyncpa [#allocation5], 0  ;;  %s488_s21 = smov [#allocation2]   ;;  %s440_s25 = scalar_lea.hbm %s575_s1, 1024 }
   0x2   :  { %s21_s22 = sshll.u32 %s488_s21, 4  ;;  %p441_p0 = scmp.ne.s32.totalorder %s575_s1, %s440_s25  ;;  %s22_s22 = int_to_ptr.vmem [resolvable:$true] %s21_s22 }
   0x3   :  { %p444_p1 = scmp.lt.u32.totalorder %s440_s25, %s575_s1 }
   0x5   :  { %p446_p2 = pnand %p444_p1, %p441_p0 }
   0x7   :  { %449 = shalt.err (!%p446_p2)
}
   0x8   :  { %s450_s30 = scalar_lea.vmem %s22_s22, 1024  ;;  %p455_p4 = scmp.lt.s32.totalorder %s22_s22, %s22_s22 }
   0x9   :  { %p451_p3 = scmp.ne.s32.totalorder %s22_s22, %s450_s30  ;;  %p456_p5 = scmp.lt.s32.totalorder %s450_s30, %s450_s30 }
   0xb   :  { %p457_p6 = por %p456_p5, %p455_p4 }
   0xd   :  { %p458_p7 = pnand %p457_p6, %p451_p3 }
   0xf   :  { %461 = shalt.err (!%p458_p7)
}
  0x10   :  { %s489_s7 = smov 64   ;;  %s490_s8 = smov 4  }
  0x11   :  { %27 = dma.hbm_to_vmem [thread:$0]  %s575_s1, 1024, %s22_s22, [#allocation3], %s489_s7, %s489_s7, %s490_s8  }
  0x12   :  { %s491_s11 = smov [#allocation4]   ;;  %s462_s15 = scalar_lea.hbm %s577_s3, 1024 }
  0x13   :  { %s35_s12 = sshll.u32 %s491_s11, 4  ;;  %p463_p8 = scmp.ne.s32.totalorder %s577_s3, %s462_s15  ;;  %s36_s12 = int_to_ptr.vmem [resolvable:$true] %s35_s12 }
  0x14   :  { %p466_p9 = scmp.lt.u32.totalorder %s462_s15, %s577_s3 }
  0x16   :  { %p468_p10 = pnand %p466_p9, %p463_p8 }
  0x18   :  { %471 = shalt.err (!%p468_p10)
}
  0x19   :  { %s472_s20 = scalar_lea.vmem %s36_s12, 1024  ;;  %p477_p12 = scmp.lt.s32.totalorder %s36_s12, %s36_s12 }
  0x1a   :  { %p473_p11 = scmp.ne.s32.totalorder %s36_s12, %s472_s20  ;;  %p478_p13 = scmp.lt.s32.totalorder %s472_s20, %s472_s20 }
  0x1c   :  { %p479_p0 = por %p478_p13, %p477_p12 }
  0x1e   :  { %p480_p1 = pnand %p479_p0, %p473_p11 }
  0x20   :  { %483 = shalt.err (!%p480_p1)
}
  0x21   :  { %41 = dma.hbm_to_vmem [thread:$0]  %s577_s3, 1024, %s36_s12, [#allocation5], %s489_s7, %s489_s7, %s490_s8  }
  0x22   :  { %484 = dma.done.wait [#allocation3], 1024  }
  0x23   :  { %485 = vsyncadd [#allocation3], 4294966272 }
  0x24   :  { %486 = dma.done.wait [#allocation5], 1024  }
  0x25   :  { %487 = vsyncadd [#allocation5], 4294966272  ;;  %v492_v0 = vmov 0.0   ;;  %vm493_vm0 = vmmov 0   ;;  %v416_v1 = vld [vmem:[#allocation2] sm:$0xff]   ;;  %v417_v2 = vld [vmem:[#allocation2 + $0x8] sm:$0xff]   ;;  %v290_v30 = vlaneseq }
  0x26   :  { %370 = vmatprep.subr.bf16.mxu0 %v492_v0  ;;  %386 = vmatprep.mubr.msk.bf16.mxu0 %vm493_vm0, %v492_v0  ;;  %v418_v3 = vld [vmem:[#allocation2 + $0x10] sm:$0xff]   ;;  %v424_v4 = vld [vmem:[#allocation4] sm:$0xff]   ;;  %v419_v5 = vld [vmem:[#allocation2 + $0x18] sm:$0xff]  }
  0x27   :  { %390 = vmatprep.subr.bf16.mxu1 %v492_v0  ;;  %406 = vmatprep.mubr.msk.bf16.mxu1 %vm493_vm0, %v492_v0  ;;  %v425_v6 = vld [vmem:[#allocation4 + $0x8] sm:$0xff]   ;;  %v420_v7 = vld [vmem:[#allocation2 + $0x20] sm:$0xff]   ;;  %v426_v8 = vld [vmem:[#allocation4 + $0x10] sm:$0xff]   ;;  %v291_v31 = vand.u32 127, %v290_v30 }
  0x28   :  { %371 = vmatpush3.bf16.msra.mxu0 %v416_v1  ;;  %391 = vmatpush3.bf16.msra.mxu1 %v424_v4  ;;  %v421_v9 = vld [vmem:[#allocation2 + $0x28] sm:$0xff]   ;;  %v427_v10 = vld [vmem:[#allocation4 + $0x18] sm:$0xff]   ;;  %v422_v11 = vld [vmem:[#allocation2 + $0x30] sm:$0xff]  }
  0x29   :  { %372 = vmatprep.subr.bf16.mxu0 %v492_v0  ;;  %392 = vmatprep.subr.bf16.mxu1 %v492_v0  ;;  %v428_v12 = vld [vmem:[#allocation4 + $0x20] sm:$0xff]   ;;  %v423_v13 = vld [vmem:[#allocation2 + $0x38] sm:$0xff]   ;;  %v52_v15 = vld [vmem:[%s574_s0 + $0x8] sm:$0xff]  ;;  %vm292_vm1 = vcmp.lt.s32.totalorder %v291_v31, 4 }
  0x2a   :  { %v51_v14 = vld [vmem:[%s574_s0] sm:$0xff]  ;;  %v429_v16 = vld [vmem:[#allocation4 + $0x28] sm:$0xff]   ;;  %v430_v18 = vld [vmem:[#allocation4 + $0x30] sm:$0xff]  }
  0x2b   :  { %v53_v17 = vpack.c.bf16 %v52_v15, %v51_v14  ;;  %v431_v19 = vld [vmem:[#allocation4 + $0x38] sm:$0xff]   ;;  %v325_v20 = vld [vmem:[%s576_s2] ss:$0 sm:$0xff] }
  0x2c   :  { %373 = vmatpush3.bf16.msra.mxu0 %v417_v2  ;;  %393 = vmatpush3.bf16.msra.mxu1 %v425_v6  ;;  %v336_v32 = vld [vmem:[%s578_s4] ss:$0 sm:$0xff] }
  0x2d   :  { %374 = vmatprep.subr.bf16.mxu0 %v492_v0  ;;  %394 = vmatprep.subr.bf16.mxu1 %v492_v0 }
  0x30   :  { %375 = vmatpush3.bf16.msra.mxu0 %v418_v3  ;;  %395 = vmatpush3.bf16.msra.mxu1 %v426_v8 }
  0x31   :  { %376 = vmatprep.subr.bf16.mxu0 %v492_v0  ;;  %396 = vmatprep.subr.bf16.mxu1 %v492_v0 }
  0x34   :  { %377 = vmatpush3.bf16.msra.mxu0 %v419_v5  ;;  %397 = vmatpush3.bf16.msra.mxu1 %v427_v10 }
  0x35   :  { %378 = vmatprep.subr.bf16.mxu0 %v492_v0  ;;  %398 = vmatprep.subr.bf16.mxu1 %v492_v0 }
  0x38   :  { %379 = vmatpush3.bf16.msra.mxu0 %v420_v7  ;;  %399 = vmatpush3.bf16.msra.mxu1 %v428_v12 }
  0x39   :  { %380 = vmatprep.subr.bf16.mxu0 %v492_v0  ;;  %400 = vmatprep.subr.bf16.mxu1 %v492_v0 }
  0x3c   :  { %381 = vmatpush3.bf16.msra.mxu0 %v421_v9  ;;  %401 = vmatpush3.bf16.msra.mxu1 %v429_v16 }
  0x3d   :  { %382 = vmatprep.subr.bf16.mxu0 %v492_v0  ;;  %402 = vmatprep.subr.bf16.mxu1 %v492_v0 }
  0x40   :  { %383 = vmatpush3.bf16.msra.mxu0 %v422_v11  ;;  %403 = vmatpush3.bf16.msra.mxu1 %v430_v18 }
  0x41   :  { %384 = vmatprep.subr.bf16.mxu0 %v492_v0  ;;  %404 = vmatprep.subr.bf16.mxu1 %v492_v0 }
  0x44   :  { %385 = vmatpush3.bf16.msra.mxu0 %v423_v13  ;;  %405 = vmatpush3.bf16.msra.mxu1 %v431_v19 }
  0x47   :  { %387 = vmatmul.mubr.bf16.vlgmr.msra.gmra.mrb[0].mxu0 %v53_v17 }
 0x11a   :  { %v159_v21 = vpop.f32.mrb[0].mxu0 }
 0x11b   :  { %v160_v22 = vadd.f32 %v325_v20, %v159_v21  ;;  %v388_v23 = vpop.f32.mrb[1].mxu0 }
 0x11c   :  { %v162_v24 = vpop.f32.mrb[2].mxu0 }
 0x11d   :  { %v163_v25 = vadd.f32 %v325_v20, %v162_v24  ;;  %v389_v26 = vpop.f32.mrb[3].mxu0  ;;  %v166_v27 = vmax.f32 %v160_v22, 0.0 }
 0x11f   :  { %v167_v28 = vmax.f32 %v163_v25, 0.0 }
 0x121   :  { %v168_v29 = vpack.c.bf16 %v167_v28, %v166_v27 }
 0x123   :  { %351 = vst [vmem:[%s579_s5] sm:$0xff] %v168_v29   ;;  %407 = vmatmul.mubr.bf16.vlgmr.msra.gmra.mrb[0].mxu1 %v168_v29 }
 0x1f6   :  { %v283_v33 = vpop.f32.mrb[0].mxu1 }
 0x1f7   :  { %v284_v34 = vadd.f32 %v336_v32, %v283_v33  ;;  %v408_v35 = vpop.f32.mrb[1].mxu1 }
 0x1f8   :  { %v286_v36 = vpop.f32.mrb[2].mxu1 }
 0x1f9   :  { %v287_v37 = vadd.f32 %v336_v32, %v286_v36  ;;  %v409_v38 = vpop.f32.mrb[3].mxu1  ;;  %v293_v39 = vsel %vm292_vm1, %v284_v34, -1e+30 }
 0x1fa   :  { %295 = vmax.xlane.f32.xlu0 %v293_v39 }
 0x1fb   :  { %v294_v40 = vsel %vm292_vm1, %v287_v37, -1e+30 }
 0x1fe   :  { %297 = vmax.xlane.f32.xlu0 %v294_v40 }
 0x287   :  { %v296_v41 = vpop.xlane.xlu0 %295 }
 0x288   :  { %v299_v42 = vsub.f32 %v293_v39, %v296_v41 }
 0x28a   :  { %v301_v43 = vmul.f32 1.442695, %v299_v42 }
 0x28b   :  { %v298_v44 = vpop.xlane.xlu0 %297 }
 0x28c   :  { %432 = vpow2.f32 %v301_v43  ;;  %v300_v45 = vsub.f32 %v294_v40, %v298_v44 }
 0x28e   :  { %v303_v46 = vmul.f32 1.442695, %v300_v45 }
 0x290   :  { %434 = vpow2.f32 %v303_v46 }
 0x296   :  { %v433_v47 = vpop.eup %432 }
 0x297   :  { %305 = vadd.xlane.f32.xlu1 %v433_v47 }
 0x29a   :  { %v435_v48 = vpop.eup %434 }
 0x29b   :  { %307 = vadd.xlane.f32.xlu1 %v435_v48 }
 0x324   :  { %v306_v49 = vpop.xlane.xlu1 %305 }
 0x325   :  { %436 = vrcp.f32 %v306_v49 }
 0x328   :  { %v308_v50 = vpop.xlane.xlu1 %307 }
 0x329   :  { %438 = vrcp.f32 %v308_v50 }
 0x32f   :  { %v437_v51 = vpop.eup %436 }
 0x330   :  { %v310_v52 = vmul.f32 %v437_v51, %v433_v47 }
 0x332   :  { %313 = vst [vmem:[%s580_s6] sm:$0xff] %v310_v52 }
 0x333   :  { %v439_v53 = vpop.eup %438 }
 0x334   :  { %v312_v54 = vmul.f32 %v439_v53, %v435_v48 }
 0x336   :  { %314 = vst [vmem:[%s580_s6 + $0x8] sm:$0xff] %v312_v54 }
 0x337   :  { %323 = vsyncpa [#allocation3], 1 }
 0x338   :  { %324 = vsyncpa [#allocation5], 1 }

</bundles_post_ra>
